<compile_context>
chip_gen: v7x
topology: tpu7x:2x2x1
jax: 0.10.0
libtpu: 0.0.40
codegen_flags: <defaults>
</compile_context>

<pallas_src>
import functools

import numpy as np

import jax
import jax.numpy as jnp
from jax import lax
from jax.experimental import pallas as pl
from jax.experimental.pallas import tpu as pltpu


def _round_up(a: int, b: int) -> int:
    return -(-a // b) * b


def _device_kind() -> str:
    try:
        return jax.devices()[0].device_kind.lower()
    except Exception:  # pragma: no cover - no device / init failure
        return ""


_KIND = _device_kind()
_IS_V5E = ("v5e" in _KIND) or ("v5 lite" in _KIND) or ("v5lite" in _KIND)
_IS_V7 = "v7" in _KIND
# Physical VMEM is 64 MiB/TC on v7x, 128 MiB on v5e/v6e -- cap the scoped
# limit accordingly so big tiles stay portable.
_VMEM_CAP = (48 << 20) if _IS_V7 else (100 << 20)


def _build_scatter_matrix(idx_ref, w_ref, base, tile_k, out_dtype):
    """Partial scatter matrix A (tile_k, tile_m): A[p, m] = sum_j w[j, m]
    where idx[j, m] - base == p.  Built in w's dtype (f32 on v5e / f32
    operands, bf16 on v6e+) and cast once for the MXU."""
    n, tile_m = idx_ref.shape
    idx = idx_ref[...] - base                       # (n, tile_m), block-relative
    w = w_ref[...]                                  # (n, tile_m)
    zero = jnp.zeros((), dtype=w.dtype)
    p_iota = lax.broadcasted_iota(jnp.int32, (tile_k, tile_m), 0)
    # n is tiny (e.g. 4 for bilinear interp) -> static unroll.
    a = jnp.where(p_iota == idx[0, :][None, :], w[0, :][None, :], zero)
    for j in range(1, n):
        a = a + jnp.where(p_iota == idx[j, :][None, :], w[j, :][None, :], zero)
    return a.astype(out_dtype)


def _apply_weights_kernel_multi_k(koff_ref, kcnt_ref, idx_ref, w_ref, x_ref,
                                  o_ref, acc_ref, *, operand_dtype):
    # koff_ref: (num_m_tiles,) i32 SMEM -- per-tile K-window start (in blocks)
    # kcnt_ref: (num_m_tiles,) i32 SMEM -- per-tile number of active K blocks
    # idx_ref:  (n, tile_m) i32        -- source pixel indices (lane-major)
    # w_ref:    (n, tile_m) build-dtype-- interpolation weights
    # x_ref:    (B, tile_k) operand    -- one K block of the input window
    # o_ref:    (B, tile_m)            -- output tile (written on last K step)
    # acc_ref:  (B, tile_m) f32        -- accumulator scratch
    i = pl.program_id(0)
    k = pl.program_id(1)

    @pl.when(k < kcnt_ref[i])
    def _():
        tile_k = x_ref.shape[1]
        base = (koff_ref[i] + k) * tile_k
        a = _build_scatter_matrix(idx_ref, w_ref, base, tile_k, operand_dtype)
        part = jnp.dot(x_ref[...], a, preferred_element_type=jnp.float32)

        @pl.when(k == 0)
        def _():
            acc_ref[...] = part          # first active step: write, no zero-init

        @pl.when(k > 0)
        def _():
            acc_ref[...] += part

    @pl.when(k == pl.num_programs(1) - 1)
    def _():
        o_ref[...] = acc_ref[...].astype(o_ref.dtype)


def _apply_weights_kernel_single_k(koff_ref, idx_ref, w_ref, x_ref, o_ref, *,
                                   operand_dtype):
    # Specialization for k_grid == 1: no accumulator scratch, no phases.
    i = pl.program_id(0)
    tile_k = x_ref.shape[1]
    base = koff_ref[i] * tile_k
    a = _build_scatter_matrix(idx_ref, w_ref, base, tile_k, operand_dtype)
    o_ref[...] = jnp.dot(x_ref[...], a,
                         preferred_element_type=jnp.float32).astype(o_ref.dtype)


class ApplyWeights:
    """JAX/Pallas port of earth2grid.healpix.ApplyWeights."""

    def __init__(self, pix, weight, *, tile_m=512, tile_k=256,
                 operand_dtype=jnp.bfloat16, a_build_dtype=None):
        pix_np = np.asarray(pix)
        w_np = np.asarray(weight)
        n, *self.shape = pix_np.shape
        self.n = int(n)
        self.operand_dtype = operand_dtype
        # A-build dtype: f32 on v5e (no bf16 VPU; also removes bf16 rounding
        # when duplicate indices' weights are summed inside A); operand dtype
        # (bf16) on v6e/v7x to halve vreg/VMEM footprint of the A build.
        if a_build_dtype is None:
            if _IS_V5E or jnp.dtype(operand_dtype) == jnp.dtype(jnp.float32):
                a_build_dtype = jnp.float32
            else:
                a_build_dtype = operand_dtype
        self.a_build_dtype = a_build_dtype
        self._tile_k_max = max(128, _round_up(int(tile_k), 128))

        idx = pix_np.reshape(self.n, -1).astype(np.int32)     # (n, M) lane-major
        wgt = w_np.reshape(self.n, -1).astype(np.float32)     # (n, M)
        self.m = idx.shape[1]
        self._min_index = int(idx.min())
        self._max_index = int(idx.max())

        # M tiling: lane-dense tiles, clamped to the problem size, and split
        # once if that would leave a single M tile (keeps the "parallel" axis
        # shardable across v7x's two TensorCores).
        m_pad128 = _round_up(self.m, 128)
        tm = min(max(128, _round_up(int(tile_m), 128)), m_pad128)
        if tm == m_pad128 and m_pad128 >= 256 and (m_pad128 // 2) % 128 == 0:
            tm = m_pad128 // 2
        self.tile_m = tm
        self.m_pad = _round_up(self.m, self.tile_m)
        self.num_m_tiles = self.m_pad // self.tile_m

        # Pad M: index edge-padded (keeps each tile's pixel window tight),
        # weight zero-padded (padded outputs are exactly 0, sliced off later).
        pad = self.m_pad - self.m
        if pad:
            idx = np.pad(idx, ((0, 0), (0, pad)), mode="edge")
            wgt = np.pad(wgt, ((0, 0), (0, pad)))

        # Per-output-tile pixel extents (drive the per-tile K-window prefetch).
        idx_tiles = idx.reshape(self.n, self.num_m_tiles, self.tile_m)
        self._tile_min = idx_tiles.min(axis=(0, 2)).astype(np.int64)
        self._tile_max = idx_tiles.max(axis=(0, 2)).astype(np.int64)

        self.index = jnp.asarray(idx)                                  # (n, m_pad)
        self.weight = jnp.asarray(wgt).astype(self.a_build_dtype)      # (n, m_pad)

    # ----------------------------------------------------------------- call
    def __call__(self, x):
        *batch_shape, npix = x.shape
        if self._min_index < 0 or self._max_index >= npix:
            raise ValueError(
                f"interpolation indices must be in [0, {npix}), got "
                f"[{self._min_index}, {self._max_index}]")

        xb = x.reshape(-1, npix)
        b = xb.shape[0]
        n = self.n
        tile_m = self.tile_m
        op_dtype = self.operand_dtype
        op_bytes = jnp.dtype(op_dtype).itemsize
        build_bytes = jnp.dtype(self.a_build_dtype).itemsize
        out_bytes = jnp.dtype(x.dtype).itemsize

        # Pad flattened batch to the sublane multiple of the operand dtype.
        sublane = max(8, 32 // op_bytes)
        b_pad = _round_up(b, sublane)

        # K tiling; window offsets/counts are in units of tile_k blocks.
        tile_k = min(self._tile_k_max, _round_up(npix, 128))
        npix_pad = _round_up(npix, tile_k)

        kmin_blk = (self._tile_min // tile_k).astype(np.int32)
        kmax_blk = (self._tile_max // tile_k).astype(np.int32)
        kcnt_np = (kmax_blk - kmin_blk + 1).astype(np.int32)
        k_grid = int(kcnt_np.max())
        total_k_steps = int(kcnt_np.sum())
        koff = jnp.asarray(kmin_blk)
        kcnt = jnp.asarray(kcnt_np)

        xb_c = xb.astype(op_dtype)
        if npix_pad != npix or b_pad != b:
            xb_c = jnp.pad(xb_c, ((0, b_pad - b), (0, npix_pad - npix)))

        # Computed VMEM budget (double-buffered blocks + acc + A headroom).
        x_blk = b_pad * tile_k * op_bytes
        out_blk = b_pad * tile_m * out_bytes
        idx_blk = n * tile_m * 4
        w_blk = n * tile_m * build_bytes
        acc_blk = b_pad * tile_m * 4 if k_grid > 1 else 0
        a_headroom = 2 * tile_k * tile_m * max(build_bytes, op_bytes)
        x_bufs = 3 if (k_grid > 1 and x_blk >= (1 << 20)) else 2
        need = (x_bufs * x_blk + 2 * (out_blk + idx_blk + w_blk)
                + acc_blk + a_headroom)
        vmem_limit = int(min(_VMEM_CAP, max(32 << 20, int(need * 1.5))))

        cost = pl.CostEstimate(
            flops=int(2 * b_pad * tile_m * tile_k * total_k_steps),
            transcendentals=0,
            bytes_accessed=int(b_pad * tile_k * op_bytes * total_k_steps
                               + self.index.size * 4
                               + self.weight.size * build_bytes
                               + b_pad * self.m_pad * out_bytes),
        )

        if k_grid == 1:
            # Fully local interpolation: every tile's window fits one K block.
            out = pl.pallas_call(
                functools.partial(_apply_weights_kernel_single_k,
                                  operand_dtype=op_dtype),
                out_shape=jax.ShapeDtypeStruct((b_pad, self.m_pad), x.dtype),
                grid_spec=pltpu.PrefetchScalarGridSpec(
                    num_scalar_prefetch=1,
                    grid=(self.num_m_tiles,),
                    in_specs=[
                        pl.BlockSpec((n, tile_m), lambda i, koff: (0, i)),
                        pl.BlockSpec((n, tile_m), lambda i, koff: (0, i)),
                        pl.BlockSpec((b_pad, tile_k),
                                     lambda i, koff: (0, koff[i])),
                    ],
                    out_specs=pl.BlockSpec((b_pad, tile_m),
                                           lambda i, koff: (0, i)),
                ),
                compiler_params=pltpu.CompilerParams(
                    dimension_semantics=("parallel",),
                    vmem_limit_bytes=vmem_limit,
                ),
                cost_estimate=cost,
            )(koff, self.index, self.weight, xb_c)
        else:
            # x block spec; triple-buffer only when blocks are big enough for
            # the extra buffer to matter (hides HBM latency at tile switches).
            x_spec_kwargs = {}
            if x_blk >= (1 << 20):
                x_spec_kwargs["pipeline_mode"] = pl.Buffered(3)
            x_spec = pl.BlockSpec(
                (b_pad, tile_k),
                # Skipped steps (k >= kcnt[i]) repeat the previous block index
                # so no new DMA is issued for them.
                lambda i, k, koff, kcnt: (0, koff[i] + jnp.minimum(k, kcnt[i] - 1)),
                **x_spec_kwargs)

            out = pl.pallas_call(
                functools.partial(_apply_weights_kernel_multi_k,
                                  operand_dtype=op_dtype),
                out_shape=jax.ShapeDtypeStruct((b_pad, self.m_pad), x.dtype),
                grid_spec=pltpu.PrefetchScalarGridSpec(
                    num_scalar_prefetch=2,
                    grid=(self.num_m_tiles, k_grid),
                    in_specs=[
                        pl.BlockSpec((n, tile_m),
                                     lambda i, k, koff, kcnt: (0, i)),
                        pl.BlockSpec((n, tile_m),
                                     lambda i, k, koff, kcnt: (0, i)),
                        x_spec,
                    ],
                    out_specs=pl.BlockSpec((b_pad, tile_m),
                                           lambda i, k, koff, kcnt: (0, i)),
                    scratch_shapes=[pltpu.VMEM((b_pad, tile_m), jnp.float32)],
                ),
                compiler_params=pltpu.CompilerParams(
                    dimension_semantics=("parallel", "arbitrary"),
                    vmem_limit_bytes=vmem_limit,
                ),
                cost_estimate=cost,
            )(koff, kcnt, self.index, self.weight, xb_c)

        out = out[:b, :self.m]
        return out.reshape(tuple(batch_shape) + tuple(self.shape))


def _reference(pix, weight, x):
    """Pure-numpy reference (direct gather)."""
    n = pix.shape[0]
    npix = x.shape[-1]
    idx = np.asarray(pix).reshape(n, -1)            # (n, M)
    w = np.asarray(weight).reshape(n, -1)           # (n, M)
    xb = np.asarray(x).reshape(-1, npix)            # (B, npix)
    out = np.zeros((xb.shape[0], idx.shape[1]), np.float32)
    for k in range(n):
        out = out + w[k][None, :] * xb[:, idx[k]]
    return out.reshape(x.shape[:-1] + tuple(pix.shape[1:]))


if __name__ == "__main__":
    key = jax.random.PRNGKey(0)
    k1, k2, k3, k4, k5 = jax.random.split(key, 5)

    # Small healpix-like setup: nside=4 -> npix=192, bilinear (n=4) interp
    # onto a 16x16 target grid, batch shape (2, 3).
    n = 4
    nside = 4
    npix = 12 * nside * nside          # 192
    out_hw = (16, 16)                  # M = 256
    batch = (2, 3)                     # B = 6

    pix = jax.random.randint(k1, (n,) + out_hw, 0, npix, dtype=jnp.int32)
    w = jax.random.uniform(k2, (n,) + out_hw, dtype=jnp.float32)
    w = w / jnp.sum(w, axis=0, keepdims=True)       # weights sum to 1 over n
    x = jax.random.normal(k3, batch + (npix,), dtype=jnp.float32)

    ref = _reference(pix, w, x)

    # 1) Exact path (f32 operands), exercises the k_grid==1 specialization.
    mod_f32 = ApplyWeights(pix, w, operand_dtype=jnp.float32)
    out_f32 = jax.block_until_ready(mod_f32(x))
    assert out_f32.shape == batch + out_hw
    assert np.allclose(np.asarray(out_f32), ref, atol=1e-5, rtol=1e-5)

    # 2) Default fast path (bf16 matmul operands, f32 accumulation).
    mod_bf16 = ApplyWeights(pix, w)
    out_bf16 = jax.block_until_ready(mod_bf16(x))
    assert out_bf16.shape == batch + out_hw
    assert np.allclose(np.asarray(out_bf16), ref, atol=5e-2, rtol=5e-2)

    # 3) Ragged output shape (M = 23*17 = 391) with small tiles to exercise
    #    M-tail padding, multiple M tiles, multi-block K accumulation and the
    #    per-tile K-count skip path.
    out_hw2 = (23, 17)
    pix2 = jax.random.randint(k4, (n,) + out_hw2, 0, npix, dtype=jnp.int32)
    w2 = jax.random.uniform(k5, (n,) + out_hw2, dtype=jnp.float32)
    w2 = w2 / jnp.sum(w2, axis=0, keepdims=True)
    ref2 = _reference(pix2, w2, x)

    mod2 = ApplyWeights(pix2, w2, tile_m=128, tile_k=128,
                        operand_dtype=jnp.float32)
    out2 = jax.block_until_ready(mod2(x))
    assert out2.shape == batch + out_hw2
    assert np.allclose(np.asarray(out2), ref2, atol=1e-5, rtol=1e-5)

    # 4) Same ragged multi-K config on the default bf16 operand path.
    mod3 = ApplyWeights(pix2, w2, tile_m=128, tile_k=128)
    out3 = jax.block_until_ready(mod3(x))
    assert out3.shape == batch + out_hw2
    assert np.allclose(np.asarray(out3), ref2, atol=5e-2, rtol=5e-2)

    print("KERNEL_OK")
</pallas_src>

<mosaic_0001>
module attributes {stable_mosaic.version = 11 : i64} {
  func.func @_apply_weights_kernel_single_k(%arg0: i32, %arg1: memref<2xi32, #tpu.memory_space<smem>>, %arg2: memref<4x128xi32, #tpu.memory_space<vmem>>, %arg3: memref<4x128xf32, #tpu.memory_space<vmem>>, %arg4: memref<8x256xf32, #tpu.memory_space<vmem>>, %arg5: memref<8x128xf32, #tpu.memory_space<vmem>>) attributes {dimension_semantics = [#tpu.dimension_semantics<parallel>], iteration_bounds = array<i64: 2>, scalar_prefetch = 1 : i64, scratch_operands = 0 : i64, tpu.core_type = #tpu.core_type<tc>, window_params = [{transform_indices = @transform_0, window_bounds = array<i64: 4, 128>}, {transform_indices = @transform_1, window_bounds = array<i64: 4, 128>}, {transform_indices = @transform_2, window_bounds = array<i64: 8, 256>}, {transform_indices = @transform_3, window_bounds = array<i64: 8, 128>}]} {
    %0 = arith.index_cast %arg0 : i32 to index
    %1 = memref.load %arg1[%0] : memref<2xi32, #tpu.memory_space<smem>>
    %c256_i32 = arith.constant 256 : i32
    %2 = arith.muli %1, %c256_i32 : i32
    %c0 = arith.constant 0 : index
    %c0_0 = arith.constant 0 : index
    %3 = vector.load %arg2[%c0, %c0_0] : memref<4x128xi32, #tpu.memory_space<vmem>>, vector<4x128xi32>
    %4 = vector.broadcast %2 : i32 to vector<4x128xi32>
    %5 = arith.subi %3, %4 : vector<4x128xi32>
    %c0_1 = arith.constant 0 : index
    %c0_2 = arith.constant 0 : index
    %6 = vector.load %arg3[%c0_1, %c0_2] : memref<4x128xf32, #tpu.memory_space<vmem>>, vector<4x128xf32>
    %7 = tpu.iota {dimensions = array<i32: 0>} : vector<256x128xi32>
    %8 = vector.extract_strided_slice %5 {offsets = [0, 0], sizes = [1, 128], strides = [1, 1]} : vector<4x128xi32> to vector<1x128xi32>
    %9 = vector.shape_cast %8 : vector<1x128xi32> to vector<128xi32>
    %10 = vector.shape_cast %9 : vector<128xi32> to vector<1x128xi32>
    %11 = vector.broadcast %10 : vector<1x128xi32> to vector<256x128xi32>
    %12 = arith.cmpi eq, %7, %11 : vector<256x128xi32>
    %13 = vector.extract_strided_slice %6 {offsets = [0, 0], sizes = [1, 128], strides = [1, 1]} : vector<4x128xf32> to vector<1x128xf32>
    %14 = vector.shape_cast %13 : vector<1x128xf32> to vector<128xf32>
    %15 = vector.shape_cast %14 : vector<128xf32> to vector<1x128xf32>
    %cst = arith.constant 0.000000e+00 : f32
    %16 = vector.shape_cast %15 : vector<1x128xf32> to vector<1x128xf32>
    %17 = vector.broadcast %16 : vector<1x128xf32> to vector<256x128xf32>
    %18 = vector.broadcast %cst : f32 to vector<256x128xf32>
    %19 = arith.select %12, %17, %18 : vector<256x128xi1>, vector<256x128xf32>
    %20 = vector.extract_strided_slice %5 {offsets = [1, 0], sizes = [1, 128], strides = [1, 1]} : vector<4x128xi32> to vector<1x128xi32>
    %21 = vector.shape_cast %20 : vector<1x128xi32> to vector<128xi32>
    %22 = vector.shape_cast %21 : vector<128xi32> to vector<1x128xi32>
    %23 = vector.broadcast %22 : vector<1x128xi32> to vector<256x128xi32>
    %24 = arith.cmpi eq, %7, %23 : vector<256x128xi32>
    %25 = vector.extract_strided_slice %6 {offsets = [1, 0], sizes = [1, 128], strides = [1, 1]} : vector<4x128xf32> to vector<1x128xf32>
    %26 = vector.shape_cast %25 : vector<1x128xf32> to vector<128xf32>
    %27 = vector.shape_cast %26 : vector<128xf32> to vector<1x128xf32>
    %cst_3 = arith.constant 0.000000e+00 : f32
    %28 = vector.shape_cast %27 : vector<1x128xf32> to vector<1x128xf32>
    %29 = vector.broadcast %28 : vector<1x128xf32> to vector<256x128xf32>
    %30 = vector.broadcast %cst_3 : f32 to vector<256x128xf32>
    %31 = arith.select %24, %29, %30 : vector<256x128xi1>, vector<256x128xf32>
    %32 = arith.addf %19, %31 : vector<256x128xf32>
    %33 = vector.extract_strided_slice %5 {offsets = [2, 0], sizes = [1, 128], strides = [1, 1]} : vector<4x128xi32> to vector<1x128xi32>
    %34 = vector.shape_cast %33 : vector<1x128xi32> to vector<128xi32>
    %35 = vector.shape_cast %34 : vector<128xi32> to vector<1x128xi32>
    %36 = vector.broadcast %35 : vector<1x128xi32> to vector<256x128xi32>
    %37 = arith.cmpi eq, %7, %36 : vector<256x128xi32>
    %38 = vector.extract_strided_slice %6 {offsets = [2, 0], sizes = [1, 128], strides = [1, 1]} : vector<4x128xf32> to vector<1x128xf32>
    %39 = vector.shape_cast %38 : vector<1x128xf32> to vector<128xf32>
    %40 = vector.shape_cast %39 : vector<128xf32> to vector<1x128xf32>
    %cst_4 = arith.constant 0.000000e+00 : f32
    %41 = vector.shape_cast %40 : vector<1x128xf32> to vector<1x128xf32>
    %42 = vector.broadcast %41 : vector<1x128xf32> to vector<256x128xf32>
    %43 = vector.broadcast %cst_4 : f32 to vector<256x128xf32>
    %44 = arith.select %37, %42, %43 : vector<256x128xi1>, vector<256x128xf32>
    %45 = arith.addf %32, %44 : vector<256x128xf32>
    %46 = vector.extract_strided_slice %5 {offsets = [3, 0], sizes = [1, 128], strides = [1, 1]} : vector<4x128xi32> to vector<1x128xi32>
    %47 = vector.shape_cast %46 : vector<1x128xi32> to vector<128xi32>
    %48 = vector.shape_cast %47 : vector<128xi32> to vector<1x128xi32>
    %49 = vector.broadcast %48 : vector<1x128xi32> to vector<256x128xi32>
    %50 = arith.cmpi eq, %7, %49 : vector<256x128xi32>
    %51 = vector.extract_strided_slice %6 {offsets = [3, 0], sizes = [1, 128], strides = [1, 1]} : vector<4x128xf32> to vector<1x128xf32>
    %52 = vector.shape_cast %51 : vector<1x128xf32> to vector<128xf32>
    %53 = vector.shape_cast %52 : vector<128xf32> to vector<1x128xf32>
    %cst_5 = arith.constant 0.000000e+00 : f32
    %54 = vector.shape_cast %53 : vector<1x128xf32> to vector<1x128xf32>
    %55 = vector.broadcast %54 : vector<1x128xf32> to vector<256x128xf32>
    %56 = vector.broadcast %cst_5 : f32 to vector<256x128xf32>
    %57 = arith.select %50, %55, %56 : vector<256x128xi1>, vector<256x128xf32>
    %58 = arith.addf %45, %57 : vector<256x128xf32>
    %c0_6 = arith.constant 0 : index
    %c0_7 = arith.constant 0 : index
    %59 = vector.load %arg4[%c0_6, %c0_7] : memref<8x256xf32, #tpu.memory_space<vmem>>, vector<8x256xf32>
    %cst_8 = arith.constant dense<0.000000e+00> : vector<8x128xf32>
    %60 = tpu.matmul %59, %58, %cst_8 {dimension_numbers = #tpu.dot_dimension_numbers<[1], [0], [0], [1], [0, 0, 1, 1], [], []>} : vector<8x256xf32>, vector<256x128xf32>, vector<8x128xf32> -> vector<8x128xf32>
    %c0_9 = arith.constant 0 : index
    %c0_10 = arith.constant 0 : index
    %61 = vector.load %arg5[%c0_9, %c0_10] : memref<8x128xf32, #tpu.memory_space<vmem>>, vector<8x128xf32>
    tpu.vector_store %arg5[%c0_9, %c0_10], %60 {strides = array<i32>} : memref<8x128xf32, #tpu.memory_space<vmem>>, vector<8x128xf32>,
    return
  }
  func.func @transform_0(%arg0: i32, %arg1: memref<2xi32, #tpu.memory_space<smem>>) -> (i32, i32) {
    %c0_i32 = arith.constant 0 : i32
    %c0_i32_0 = arith.constant 0 : i32
    return %c0_i32, %arg0 : i32, i32
  }
  func.func @transform_1(%arg0: i32, %arg1: memref<2xi32, #tpu.memory_space<smem>>) -> (i32, i32) {
    %c0_i32 = arith.constant 0 : i32
    %c0_i32_0 = arith.constant 0 : i32
    return %c0_i32, %arg0 : i32, i32
  }
  func.func @transform_2(%arg0: i32, %arg1: memref<2xi32, #tpu.memory_space<smem>>) -> (i32, i32) {
    %0 = arith.index_cast %arg0 : i32 to index
    %1 = memref.load %arg1[%0] : memref<2xi32, #tpu.memory_space<smem>>
    %c0_i32 = arith.constant 0 : i32
    %c0_i32_0 = arith.constant 0 : i32
    return %c0_i32, %1 : i32, i32
  }
  func.func @transform_3(%arg0: i32, %arg1: memref<2xi32, #tpu.memory_space<smem>>) -> (i32, i32) {
    %c0_i32 = arith.constant 0 : i32
    %c0_i32_0 = arith.constant 0 : i32
    return %c0_i32, %arg0 : i32, i32
  }
}

</mosaic_0001>

<bundles_post_ra>
// kernel: tpu_custom_call.1
= control target key start
LH: loop header
LB: loop body
LE: loop exit
PB: predicated region body
PF: predicated region fallthrough
CT: control target
= control target key end

     0   :  { %s2032_s0 = inlined_call_operand.hbm [shape: s32[2], index: 0, kind: input, shape index: {}]   ;;  %s2033_s1 = inlined_call_operand.hbm [shape: s32[4,256], index: 1, kind: input, shape index: {}]   ;;  %s2034_s2 = inlined_call_operand.hbm [shape: f32[4,256], index: 2, kind: input, shape index: {}]   ;;  %s2035_s3 = inlined_call_operand.hbm [shape: f32[8,256], index: 3, kind: input, shape index: {}]   ;;  %s2036_s4 = inlined_call_operand.hbm [shape: f32[8,256], index: 4, kind: output, shape index: {}]  }
   0x1   :  { %2043 = sst [smem:[#allocation19_spill]] %s2033_s1  ;;  %s1064_s17 = scalar_lea.hbm %s2032_s0, 16 }
   0x2   :  { %2044 = sst [smem:[#allocation20_spill]] %s2034_s2  ;;  %p1065_p0 = scmp.ne.s32.totalorder %s2032_s0, %s1064_s17 }
   0x3   :  { %p1068_p1 = scmp.lt.u32.totalorder %s1064_s17, %s2032_s0 }
   0x5   :  { %p1070_p2 = pnand %p1068_p1, %p1065_p0 }
   0x7   :  { %1073 = shalt.err (!%p1070_p2)  }
   0x8   :  { %s1266_s22 = smov [#allocation3]  }
   0x9   :  { %10 = dma.hbm_to_smem %s2032_s0, 16, %s1266_s22, [#allocation2] }
   0xa   :  { %1220 = dma.done.wait [#allocation2], 16 }
   0xb   :  { %1221 = vsyncadd [#allocation2], 4294967280 }
   0xc   :  { %12 = sfence }
   0xd   :  { %13 = vsyncpa [#allocation5], 0 }
   0xe   :  { %15 = vsyncpa [#allocation5 + $0x1], 0 }
   0xf   :  { %16 = vsyncpa [#allocation8], 0 }
  0x10   :  { %18 = vsyncpa [#allocation8 + $0x1], 0 }
  0x11   :  { %19 = vsyncpa [#allocation6], 0 }
  0x12   :  { %21 = vsyncpa [#allocation6 + $0x1], 0  ;;  %s1308_s25 = smov 0   ;;  %s1310_s26 = smov 0  }
  0x13   :  { %s1312_s27 = smov 0   ;;  %s1314_s28 = smov 0  }
  0x14   :  { %s1316_s29 = smov 0   ;;  %s1318_s0 = smov 0  }
  0x15   :  { %s1320_s30 = smov 0  }
  0x16 LB: > { %s1344_s5 = sadd.s32 4294967295, %s1264_s30   ;;  %s891_s6 = sadd.s32 4294967294, %s1264_s30   ;;  %s1264_s30 = sphi %s1320_s30, %s2075_s30   ;;  %s1260_s0 = sphi %s1318_s0, %s2074_s0   ;;  %s1256_s29 = sphi %s1316_s29, %s2073_s29   ;;  %s1252_s28 = sphi %s1314_s28, %s2072_s28   ;;  %s1248_s27 = sphi %s1312_s27, %s2071_s27   ;;  %s1244_s26 = sphi %s1310_s26, %s2070_s26   ;;  %s1240_s25 = sphi %s1308_s25, %s2069_s25  }
  0x17   : > { %s1348_s7 = sadd.s32 1, %s1264_s30   ;;  %s34_s8 = sadd.s32 1, %s1260_s0 }
  0x18   : > { %s31_s9 = ssub.s32 %s1264_s30, %s1348_s7  ;;  %p41_p3 = scmp.ne.s32.totalorder %s1260_s0, %s1256_s29 }
  0x19   : > { %p32_p4 = scmp.eq.s32.totalorder %s31_s9, 0  ;;  %p2039_p5 = scmp.eq.s32.totalorder %s1264_s30, 0 }
  0x1a   : > { %p47_p6 = scmp.ne.s32.totalorder %s1256_s29, %s1252_s28  ;;  %p2040_p7 = scmp.eq.s32.totalorder %s1344_s5, 0 }
  0x1b   : > { %s1360_s10 = scalar_select %p32_p4, %s1260_s0, %s34_s8  }
  0x1c   : > { %p43_p8 = por %p2039_p5, %p41_p3  ;;  %p1366_p9 = por %p2040_p7, %p47_p6 }
  0x1d   : > { %2045 = sst [smem:[#allocation18_spill]] %s1360_s10  ;;  %p125_p10 = scmp.eq.s32.totalorder %s1344_s5, 1 }
  0x1e   : > { %s2046_s11 = scalar_select %p1366_p9, 1, 0 }
  0x1f   : > { %s1371_s12 = sld [smem:[#allocation3 + %s1348_s7]]  ;;  %p131_p11 = scmp.eq.s32.totalorder %s891_s6, 1 }
  0x20   : > { %p1375_p13 = por %p125_p10, %p41_p3  ;;  %p2038_p0 = scmp.lt.s32.totalorder %s1264_s30, 2 }
  0x21   : > { %p1380_p1 = por %p131_p11, %p47_p6  ;;  %s2037_s15 = sand.u32 1, %s1260_s0  }
  0x22   : > { %s2047_s13 = scalar_select %p1375_p13, 1, 0 }
  0x23   : > { %s2048_s14 = scalar_select %p1380_p1, 1, 0 }
  0x24   : > { %s1387_s16 = sshll.u32 %s2037_s15, 2  ;;  %s895_s17 = sshll.u32 %s1264_s30, 6 }
  0x25   : > { %p1392_p2 = pnand %p2038_p0, %p43_p8  ;;  %s169_s19 = sand.u32 1, %s1264_s30  }
  0x26   : > { %s2050_s2 = sld [smem:[#allocation20_spill]]  ;;  %s173_s23 = scalar_lea.vmem [#allocation7], %s1387_s16 }
  0x27   : > { %s180_s24 = sshll.u32 %s173_s23, 4  ;;  %s1409_s6 = scalar_lea.sflag [#allocation8], %s169_s19  ;;  %s1406_s24 = int_to_ptr.vmem [resolvable:$true] %s180_s24 }
  0x28   : > { %p1076_p8 = pneg %p1392_p2 }
  0x2c   : > { %s1402_s22 = scalar_lea.hbm %s2050_s2, %s895_s17  ;;  %s1079_s21 = scalar_lea.hbm %s2050_s2, 128 }
  0x2d   : > { %s1074_s8 = scalar_lea.hbm %s1402_s22, 64  ;;  %p1080_p12 = scmp.lt.u32.totalorder %s1402_s22, %s2050_s2 }
  0x2e   : > { %p1075_p6 = scmp.ne.s32.totalorder %s1402_s22, %s1074_s8  ;;  %p1081_p0 = scmp.lt.u32.totalorder %s1079_s21, %s1074_s8 }
  0x2f   : > { %p1083_p7 = scmp.lt.u32.totalorder %s1074_s8, %s1402_s22 }
  0x30   : > { %p1077_p10 = pnand %p1076_p8, %p1075_p6  ;;  %p1082_p5 = por %p1081_p0, %p1080_p12 }
  0x32   : > { %p1078_p11 = pneg %p1077_p10  ;;  %p1084_p3 = por %p1083_p7, %p1082_p5 }
  0x34   : > { %p1085_p4 = pnand %p1084_p3, %p1078_p11 }
  0x36   : > { %1088 = shalt.err (!%p1085_p4)
}
  0x37   : > { %s1089_s19 = scalar_lea.vmem %s1406_s24, 64  ;;  %s1267_s9 = smov [#allocation7]  }
  0x38   : > { %p1090_p6 = scmp.ne.s32.totalorder %s1406_s24, %s1089_s19  ;;  %s1094_s20 = sshll.u32 %s1267_s9, 4  ;;  %s1095_s20 = int_to_ptr.vmem [resolvable:$false] %s1094_s20 }
  0x39   : > { %s1096_s15 = scalar_lea.vmem %s1095_s20, 128  ;;  %p1097_p13 = scmp.lt.s32.totalorder %s1406_s24, %s1095_s20 }
  0x3a   : > { %p1092_p10 = pnand %p1090_p6, %p1076_p8  ;;  %p1098_p12 = scmp.lt.s32.totalorder %s1096_s15, %s1089_s19 }
  0x3c   : > { %p1093_p1 = pneg %p1092_p10  ;;  %p1099_p0 = por %p1098_p12, %p1097_p13 }
  0x3e   : > { %p1100_p5 = pnand %p1099_p0, %p1093_p1 }
  0x40   : > { %1103 = shalt.err (!%p1100_p5)
}
  0x41   : > { %995 = dma.hbm_to_vmem [thread:$0]  (!%p1392_p2), %s1402_s22, 64, %s1406_s24, %s1409_s6  }
  0x42   : > { %p2051_p7 = scmp.lt.s32.totalorder %s1264_s30, 3  ;;  %p2052_p3 = scmp.ge.s32.totalorder %s1264_s30, 1 }
  0x43   : > { %s2054_s1 = sld [smem:[#allocation19_spill]]  ;;  %s155_s9 = scalar_lea.vmem [#allocation4], %s1387_s16 }
  0x44   : > { %p1441_p4 = pnand %p2052_p3, %p2051_p7  ;;  %s162_s20 = sshll.u32 %s155_s9, 4  ;;  %s163_s20 = int_to_ptr.vmem [resolvable:$true] %s162_s20 }
  0x45   : > { %s2055_s22 = sand.u32 1, %s1260_s0  }
  0x46   : > { %s2053_s8 = scalar_select %p1441_p4, 1, 0 }
  0x47   : > { %s152_s24 = scalar_lea.sflag [#allocation5], %s2055_s22 }
  0x49   : > { %s1450_s19 = scalar_lea.hbm %s2054_s1, %s895_s17  ;;  %s1109_s17 = scalar_lea.hbm %s2054_s1, 128 }
  0x4a   : > { %s1104_s15 = scalar_lea.hbm %s1450_s19, 64  ;;  %p1110_p6 = scmp.lt.u32.totalorder %s1450_s19, %s2054_s1 }
  0x4b   : > { %p1105_p13 = scmp.ne.s32.totalorder %s1450_s19, %s1104_s15  ;;  %p1111_p10 = scmp.lt.u32.totalorder %s1109_s17, %s1104_s15 }
  0x4c   : > { %p1113_p0 = scmp.lt.u32.totalorder %s1104_s15, %s1450_s19 }
  0x4d   : > { %p1107_p1 = pnand %p1105_p13, %p1076_p8  ;;  %p1112_p12 = por %p1111_p10, %p1110_p6 }
  0x4f   : > { %p1108_p11 = pneg %p1107_p1  ;;  %p1114_p5 = por %p1113_p0, %p1112_p12 }
  0x51   : > { %p1115_p7 = pnand %p1114_p5, %p1108_p11 }
  0x53   : > { %1118 = shalt.err (!%p1115_p7)
}
  0x54   : > { %s1119_s16 = scalar_lea.vmem %s163_s20, 64  ;;  %s1268_s9 = smov [#allocation4]  }
  0x55   : > { %p1120_p3 = scmp.ne.s32.totalorder %s163_s20, %s1119_s16  ;;  %s1124_s2 = sshll.u32 %s1268_s9, 4  ;;  %s1125_s2 = int_to_ptr.vmem [resolvable:$false] %s1124_s2 }
  0x56   : > { %s1126_s10 = scalar_lea.vmem %s1125_s2, 128  ;;  %p1127_p9 = scmp.lt.s32.totalorder %s163_s20, %s1125_s2 }
  0x57   : > { %p1122_p13 = pnand %p1120_p3, %p1076_p8  ;;  %p1128_p4 = scmp.lt.s32.totalorder %s1126_s10, %s1119_s16 }
  0x59   : > { %p1123_p1 = pneg %p1122_p13  ;;  %p1129_p6 = por %p1128_p4, %p1127_p9 }
  0x5b   : > { %p1130_p10 = pnand %p1129_p6, %p1123_p1 }
  0x5d   : > { %1133 = shalt.err (!%p1130_p10)
}
  0x5e   : > { %992 = dma.hbm_to_vmem [thread:$0]  (!%p1392_p2), %s1450_s19, 64, %s163_s20, %s152_s24  }
  0x5f   : > { %s83_s22 = sld [smem:[#allocation3 + %s1264_s30]]  ;;  %p95_p9 = scmp.ne.s32.totalorder %s1248_s27, %s1244_s26 }
  0x60   : > { %p101_p8 = scmp.ne.s32.totalorder %s1244_s26, %s1240_s25  ;;  %p2056_p4 = scmp.eq.s32.totalorder %s1344_s5, 0 }
  0x61   : > { %s189_s15 = sand.u32 1, %s1248_s27   ;;  %p2058_p12 = scmp.eq.s32.totalorder %s1264_s30, 0 }
  0x62   : > { %p1481_p11 = por %p101_p8, %p2056_p4  ;;  %s88_s17 = sadd.s32 1, %s1248_s27 }
  0x63   : > { %p97_p0 = por %p95_p9, %p2058_p12  ;;  %s898_s23 = sshll.u32 %s189_s15, 4 }
  0x64   : > { %p2059_p7 = scmp.lt.s32.totalorder %s1264_s30, 2  ;;  %s191_s9 = scalar_lea.vmem [#allocation9], %s898_s23 }
  0x65   : > { %s85_s21 = ssub.s32 %s83_s22, %s1371_s12  ;;  %s200_s12 = sshll.u32 %s191_s9, 4  ;;  %s1504_s12 = int_to_ptr.vmem [resolvable:$true] %s200_s12 }
  0x66   : > { %p86_p5 = scmp.eq.s32.totalorder %s85_s21, 0  ;;  %p1492_p3 = pnand %p2059_p7, %p97_p0 }
  0x67   : > { %s981_s25 = scalar_select %p97_p0, [#allocation3], [#allocation11] }
  0x68   : > { %s1497_s19 = scalar_select %p86_p5, %s1248_s27, %s88_s17  }
  0x69   : > { %s982_s20 = scalar_select %p97_p0, %s1264_s30, 0 }
  0x6a   : > { %p2061_p2 = pmov %p2059_p7  ;;  %p1136_p6 = pneg %p1492_p3 }
  0x6b   : > { %s1139_s23 = scalar_lea.hbm %s2035_s3, 256 }
  0x6c   : > { %s2077_s25 = smov (!%p2061_p2, %s981_s25), [#allocation12]  ;;  %p2062_p13 = pmov %p2061_p2 }
  0x6e   : > { %s2079_s20 = smov (!%p2062_p13, %s982_s20), 0 }
  0x6f   : > { %s192_s24 = sld [smem:[%s2077_s25 + %s2079_s20]] }
  0x75   : > { %s911_s2 = sshll.u32 %s192_s24, 8 }
  0x76   : > { %s198_s15 = scalar_lea.hbm %s2035_s3, %s911_s2 }
  0x77   : > { %s1134_s21 = scalar_lea.hbm %s198_s15, 256  ;;  %p1140_p8 = scmp.lt.u32.totalorder %s198_s15, %s2035_s3 }
  0x78   : > { %p1135_p1 = scmp.ne.s32.totalorder %s198_s15, %s1134_s21  ;;  %p1141_p4 = scmp.lt.u32.totalorder %s1139_s23, %s1134_s21 }
  0x79   : > { %p1143_p0 = scmp.lt.u32.totalorder %s1134_s21, %s198_s15 }
  0x7a   : > { %p1137_p10 = pnand %p1136_p6, %p1135_p1  ;;  %p1142_p12 = por %p1141_p4, %p1140_p8 }
  0x7c   : > { %p1138_p9 = pneg %p1137_p10  ;;  %p1144_p5 = por %p1143_p0, %p1142_p12 }
  0x7e   : > { %p1145_p7 = pnand %p1144_p5, %p1138_p9 }
  0x80   : > { %1148 = shalt.err (!%p1145_p7)
}
  0x81   : > { %s1149_s24 = scalar_lea.vmem %s1504_s12, 256  ;;  %s1269_s1 = smov [#allocation9]  }
  0x82   : > { %p1150_p2 = scmp.ne.s32.totalorder %s1504_s12, %s1149_s24  ;;  %s1154_s9 = sshll.u32 %s1269_s1, 4  ;;  %s1155_s9 = int_to_ptr.vmem [resolvable:$false] %s1154_s9 }
  0x83   : > { %s1156_s2 = scalar_lea.vmem %s1155_s9, 512  ;;  %p1157_p10 = scmp.lt.s32.totalorder %s1504_s12, %s1155_s9 }
  0x84   : > { %p1152_p13 = pnand %p1150_p2, %p1136_p6  ;;  %p1158_p8 = scmp.lt.s32.totalorder %s1156_s2, %s1149_s24 }
  0x86   : > { %p1153_p1 = pneg %p1152_p13  ;;  %p1159_p4 = por %p1158_p8, %p1157_p10 }
  0x88   : > { %p1160_p12 = pnand %p1159_p4, %p1153_p1 }
  0x8a   : > { %1163 = shalt.err (!%p1160_p12)
}
  0x8b   : > { %1000 = dma.hbm_to_vmem [thread:$0]  (!%p1492_p3), %s198_s15, 256, %s1504_s12, %s1409_s6  }
  0x8c   : > { %p2063_p9 = scmp.ne.s32.totalorder %s2053_s8, 0 }
  0x8d   : > { %s1533_s10 = sand.u32 (!%p2063_p9), 1, %s1256_s29   ;;  %p2064_p6 = scmp.ne.s32.totalorder (!%p2063_p9), %s2046_s11, 0 }
  0x8e   : > { %209 = sbr.rel (%p2063_p9) target bundleno = 501 (0x1f5), region = 32  ;;  %s902_s22 = sshll.u32 (!%p2063_p9), %s1533_s10, 2 }
  0x8f   : > { %s212_s21 = scalar_lea.sflag (!%p2063_p9), [#allocation5], %s1533_s10  ;;  %s215_s17 = scalar_lea.vmem (!%p2063_p9), [#allocation4], %s902_s22 }
  0x95   : > { %1223 = dma.done.wait (%p2064_p6), %s212_s21, 64  }
  0x96   : > { %1225 = vsyncadd (%p2064_p6), %s212_s21, 4294967232  ;;  %s220_s6 = sand.u32 1, %s1344_s5   ;;  %s224_s8 = scalar_lea.vmem [#allocation7], %s902_s22 }
  0x97   : > { %s221_s16 = scalar_lea.sflag [#allocation8], %s220_s6 }
  0x98   : > { %1227 = dma.done.wait (%p2064_p6), %s221_s16, 64  }
  0x99   : > { %1229 = vsyncadd (%p2064_p6), %s221_s16, 4294967232  ;;  %s231_s12 = sand.u32 1, %s1244_s26  }
  0x9a   : > { %s1547_s15 = sshll.u32 %s231_s12, 4 }
  0x9b   : > { %s233_s23 = scalar_lea.vmem [#allocation9], %s1547_s15 }
  0x9c   : > { %1231 = dma.done.wait (%p1481_p11), %s221_s16, 256  }
  0x9d   : > { %1233 = vsyncadd (%p1481_p11), %s221_s16, 4294967040  ;;  %v274_v0 = vlaneseq  ;;  %s268_s25 = sld [smem:[#allocation3 + %s1344_s5]]  ;;  %v270_v14 = vld [vmem:[%s215_s17] sm:$0xf]  ;;  %v273_v15 = vld [vmem:[%s224_s8] sm:$0xf] }
  0x9e   : > { %v692_v21 = vld [vmem:[%s233_s23 + $0x8] sm:$0xff]  ;;  %s905_s18 = sshll.u32 %s1533_s10, 3  ;;  %s908_s20 = sshll.u32 %s1344_s5, 7 }
  0x9f   : > { %v1555_v1 = vshrl.u32 %v274_v0, 7  ;;  %757 = vmatprep.mubr.f32.mxu0 %v692_v21  ;;  %s265_s24 = scalar_lea.vmem [#allocation10], %s905_s18  ;;  %s1979_s22 = scalar_lea.hbm %s2036_s4, %s908_s20 }
  0xa0   : > { %s778_s1 = sshll.u32 %s265_s24, 4  ;;  %s765_s21 = scalar_lea.sflag [#allocation6], %s1533_s10  ;;  %s1981_s1 = int_to_ptr.vmem [resolvable:$true] %s778_s1 }
  0xa1   : > { %v309_v2 = vsub.s32 0, %v1555_v1  ;;  %v381_v3 = vsub.s32 1, %v1555_v1  ;;  %v485_v4 = vsub.s32 2, %v1555_v1  ;;  %v589_v5 = vsub.s32 3, %v1555_v1  ;;  %s1164_s17 = scalar_lea.vmem %s1981_s1, 128  ;;  %p2065_p3 = scmp.ne.s32.totalorder %s2047_s13, 0 }
  0xa2   : > { %v291_v6 = vadd.s32 128, %v1555_v1  ;;  %v292_v7 = vadd.s32 136, %v1555_v1  ;;  %v1564_v8 = vadd.s32 8, %v1555_v1  ;;  %v1567_v9 = vadd.s32 144, %v1555_v1  ;;  %p1165_p11 = scmp.ne.s32.totalorder %s1981_s1, %s1164_s17  ;;  %s1270_s5 = smov [#allocation10]  }
  0xa3   : > { %v1570_v10 = vadd.s32 152, %v1555_v1  ;;  %v1573_v11 = vadd.s32 16, %v1555_v1  ;;  %v1576_v12 = vadd.s32 24, %v1555_v1  ;;  %v1579_v13 = vadd.s32 160, %v1555_v1  ;;  %s906_s11 = sshll.u32 %s268_s25, 8  ;;  %s1168_s6 = sshll.u32 %s1270_s5, 4  ;;  %s1169_s6 = int_to_ptr.vmem [resolvable:$false] %s1168_s6 }
  0xa4   : > { %v1582_v16 = vadd.s32 168, %v1555_v1  ;;  %v271_v17 = vstv %s906_s11  ;;  %v1584_v18 = vrot.slane %v273_v15, %v309_v2  ;;  %v1586_v19 = vrot.slane %v273_v15, %v381_v3  ;;  %p1166_p0 = pnand %p1165_p11, %p2065_p3  ;;  %s1170_s16 = scalar_lea.vmem %s1169_s6, 256 }
  0xa5   : > { %v1588_v20 = vrot.slane %v273_v15, %v485_v4  ;;  %v272_v22 = vsub.s32 %v270_v14, %v271_v17  ;;  %v1592_v23 = vrot.slane %v273_v15, %v589_v5  ;;  %v1595_v24 = vadd.s32 32, %v1555_v1  ;;  %p1171_p7 = scmp.lt.s32.totalorder %s1981_s1, %s1169_s6  ;;  %p1172_p2 = scmp.lt.s32.totalorder %s1170_s16, %s1164_s17 }
  0xa6   : > { %v1598_v25 = vadd.s32 40, %v1555_v1  ;;  %v1601_v26 = vadd.s32 176, %v1555_v1  ;;  %v1604_v27 = vadd.s32 184, %v1555_v1  ;;  %v1607_v28 = vadd.s32 48, %v1555_v1  ;;  %p1167_p5 = pneg %p1166_p0 }
  0xa7   : > { %v1610_v29 = vadd.s32 56, %v1555_v1  ;;  %v1612_v30 = vrot.slane %v272_v22, %v309_v2  ;;  %v1614_v31 = vrot.slane %v272_v22, %v381_v3  ;;  %v1616_v32 = vrot.slane %v272_v22, %v485_v4  ;;  %p1173_p13 = por %p1172_p2, %p1171_p7 }
  0xa8   : > { %v1618_v33 = vrot.slane %v272_v22, %v589_v5  ;;  %v1621_v34 = vadd.s32 192, %v1555_v1  ;;  %v1624_v35 = vadd.s32 200, %v1555_v1  ;;  %v1627_v36 = vadd.s32 64, %v1555_v1 }
  0xa9   : > { %v1630_v37 = vadd.s32 72, %v1555_v1  ;;  %vm327_vm0 = vcmp.eq.s32.totalorder %v291_v6, %v1612_v30  ;;  %vm328_vm1 = vcmp.eq.s32.totalorder %v292_v7, %v1612_v30  ;;  %vm399_vm2 = vcmp.eq.s32.totalorder %v291_v6, %v1614_v31  ;;  %p1174_p1 = pnand %p1173_p13, %p1167_p5 }
  0xaa   : > { %vm400_vm3 = vcmp.eq.s32.totalorder %v292_v7, %v1614_v31  ;;  %v363_v38 = vsel %vm327_vm0, %v1584_v18, 0.0  ;;  %v364_v39 = vsel %vm328_vm1, %v1584_v18, 0.0  ;;  %v435_v40 = vsel %vm399_vm2, %v1586_v19, 0.0 }
  0xab   : > { %v436_v41 = vsel %vm400_vm3, %v1586_v19, 0.0  ;;  %v467_v42 = vadd.f32 %v435_v40, %v363_v38  ;;  %vm503_vm4 = vcmp.eq.s32.totalorder %v291_v6, %v1616_v32  ;;  %vm504_vm5 = vcmp.eq.s32.totalorder %v292_v7, %v1616_v32 }
  0xac   : > { %v468_v43 = vadd.f32 %v436_v41, %v364_v39  ;;  %v539_v44 = vsel %vm503_vm4, %v1588_v20, 0.0  ;;  %v540_v45 = vsel %vm504_vm5, %v1588_v20, 0.0  ;;  %vm607_vm6 = vcmp.eq.s32.totalorder %v291_v6, %v1618_v33 }
  0xad   : > { %vm608_vm7 = vcmp.eq.s32.totalorder %v292_v7, %v1618_v33  ;;  %v571_v46 = vadd.f32 %v539_v44, %v467_v42  ;;  %v643_v48 = vsel %vm607_vm6, %v1592_v23, 0.0  ;;  %vm311_vm8 = vcmp.eq.s32.totalorder %v1555_v1, %v1612_v30 }
  0xae   : > { %v572_v47 = vadd.f32 %v540_v45, %v468_v43  ;;  %v644_v49 = vsel %vm608_vm7, %v1592_v23, 0.0  ;;  %vm312_vm9 = vcmp.eq.s32.totalorder %v1564_v8, %v1612_v30  ;;  %vm383_vm10 = vcmp.eq.s32.totalorder %v1555_v1, %v1614_v31 }
  0xaf   : > { %vm384_vm11 = vcmp.eq.s32.totalorder %v1564_v8, %v1614_v31  ;;  %v675_v50 = vadd.f32 %v643_v48, %v571_v46  ;;  %v347_v52 = vsel %vm311_vm8, %v1584_v18, 0.0  ;;  %v348_v53 = vsel %vm312_vm9, %v1584_v18, 0.0 }
  0xb0   : > { %v676_v51 = vadd.f32 %v644_v49, %v572_v47  ;;  %v419_v54 = vsel %vm383_vm10, %v1586_v19, 0.0  ;;  %v420_v55 = vsel %vm384_vm11, %v1586_v19, 0.0  ;;  %vm487_vm12 = vcmp.eq.s32.totalorder %v1555_v1, %v1616_v32 }
  0xb1   : > { %vm488_vm13 = vcmp.eq.s32.totalorder %v1564_v8, %v1616_v32  ;;  %v451_v57 = vadd.f32 %v419_v54, %v347_v52  ;;  %v452_v58 = vadd.f32 %v420_v55, %v348_v53  ;;  %v523_v59 = vsel %vm487_vm12, %v1588_v20, 0.0 }
  0xb2   : > { %v947_v56 = vpack.c.bf16 %v676_v51, %v675_v50  ;;  %v524_v60 = vsel %vm488_vm13, %v1588_v20, 0.0  ;;  %vm591_vm14 = vcmp.eq.s32.totalorder %v1555_v1, %v1618_v33  ;;  %vm592_vm15 = vcmp.eq.s32.totalorder %v1564_v8, %v1618_v33 }
  0xb3   : > { %vm329_vm0 = vcmp.eq.s32.totalorder %v1567_v9, %v1612_v30  ;;  %v555_v61 = vadd.f32 %v523_v59, %v451_v57  ;;  %v556_v62 = vadd.f32 %v524_v60, %v452_v58  ;;  %v627_v63 = vsel %vm591_vm14, %v1592_v23, 0.0 }
  0xb4   : > { %948 = vmatprep.subr.bf16.mxu0 %v947_v56  ;;  %v628_v0 = vsel %vm592_vm15, %v1592_v23, 0.0  ;;  %vm330_vm1 = vcmp.eq.s32.totalorder %v1570_v10, %v1612_v30  ;;  %v365_v2 = vsel %vm329_vm0, %v1584_v18, 0.0  ;;  %vm401_vm2 = vcmp.eq.s32.totalorder %v1567_v9, %v1614_v31 }
  0xb5   : > { %vm402_vm3 = vcmp.eq.s32.totalorder %v1570_v10, %v1614_v31  ;;  %v659_v3 = vadd.f32 %v627_v63, %v555_v61  ;;  %v660_v4 = vadd.f32 %v628_v0, %v556_v62  ;;  %v366_v5 = vsel %vm330_vm1, %v1584_v18, 0.0 }
  0xb6   : > { %v437_v6 = vsel %vm401_vm2, %v1586_v19, 0.0  ;;  %v438_v7 = vsel %vm402_vm3, %v1586_v19, 0.0  ;;  %vm505_vm4 = vcmp.eq.s32.totalorder %v1567_v9, %v1616_v32  ;;  %vm506_vm5 = vcmp.eq.s32.totalorder %v1570_v10, %v1616_v32 }
  0xb7   : > { %v469_v8 = vadd.f32 %v437_v6, %v365_v2  ;;  %v949_v14 = vpack.c.bf16 %v660_v4, %v659_v3  ;;  %v470_v15 = vadd.f32 %v438_v7, %v366_v5  ;;  %v541_v17 = vsel %vm505_vm4, %v1588_v20, 0.0 }
  0xb8   : > { %v542_v21 = vsel %vm506_vm5, %v1588_v20, 0.0  ;;  %vm609_vm6 = vcmp.eq.s32.totalorder %v1567_v9, %v1618_v33  ;;  %vm610_vm7 = vcmp.eq.s32.totalorder %v1570_v10, %v1618_v33  ;;  %vm313_vm8 = vcmp.eq.s32.totalorder %v1573_v11, %v1612_v30 }
  0xb9   : > { %v573_v22 = vadd.f32 %v541_v17, %v469_v8  ;;  %950 = vmatpush3.bf16.msra.mxu0 %v949_v14  ;;  %v574_v38 = vadd.f32 %v542_v21, %v470_v15  ;;  %v645_v39 = vsel %vm609_vm6, %v1592_v23, 0.0  ;;  %v646_v40 = vsel %vm610_vm7, %v1592_v23, 0.0 }
  0xba   : > { %vm314_vm9 = vcmp.eq.s32.totalorder %v1576_v12, %v1612_v30  ;;  %v349_v42 = vsel %vm313_vm8, %v1584_v18, 0.0  ;;  %vm385_vm10 = vcmp.eq.s32.totalorder %v1573_v11, %v1614_v31  ;;  %vm386_vm11 = vcmp.eq.s32.totalorder %v1576_v12, %v1614_v31 }
  0xbb   : > { %v677_v41 = vadd.f32 %v645_v39, %v573_v22  ;;  %v350_v9 = vsel %vm314_vm9, %v1584_v18, 0.0  ;;  %v678_v10 = vadd.f32 %v646_v40, %v574_v38  ;;  %v421_v43 = vsel %vm385_vm10, %v1586_v19, 0.0 }
  0xbc   : > { %vm489_vm12 = vcmp.eq.s32.totalorder %v1573_v11, %v1616_v32  ;;  %v422_v44 = vsel %vm386_vm11, %v1586_v19, 0.0  ;;  %v453_v45 = vadd.f32 %v421_v43, %v349_v42  ;;  %vm490_vm13 = vcmp.eq.s32.totalorder %v1576_v12, %v1616_v32 }
  0xbd   : > { %v525_v46 = vsel %vm489_vm12, %v1588_v20, 0.0  ;;  %v951_v47 = vpack.c.bf16 %v678_v10, %v677_v41  ;;  %v454_v48 = vadd.f32 %v422_v44, %v350_v9  ;;  %v526_v49 = vsel %vm490_vm13, %v1588_v20, 0.0 }
  0xbe   : > { %vm593_vm14 = vcmp.eq.s32.totalorder %v1573_v11, %v1618_v33  ;;  %v557_v50 = vadd.f32 %v525_v46, %v453_v45  ;;  %vm594_vm15 = vcmp.eq.s32.totalorder %v1576_v12, %v1618_v33  ;;  %vm331_vm0 = vcmp.eq.s32.totalorder %v1579_v13, %v1612_v30 }
  0xbf   : > { %v629_v51 = vsel %vm593_vm14, %v1592_v23, 0.0  ;;  %952 = vmatprep.subr.bf16.mxu0 %v951_v47  ;;  %v558_v52 = vadd.f32 %v526_v49, %v454_v48  ;;  %v630_v53 = vsel %vm594_vm15, %v1592_v23, 0.0  ;;  %vm332_vm1 = vcmp.eq.s32.totalorder %v1582_v16, %v1612_v30 }
  0xc0   : > { %v367_v54 = vsel %vm331_vm0, %v1584_v18, 0.0  ;;  %v661_v55 = vadd.f32 %v629_v51, %v557_v50  ;;  %v368_v11 = vsel %vm332_vm1, %v1584_v18, 0.0  ;;  %vm403_vm2 = vcmp.eq.s32.totalorder %v1579_v13, %v1614_v31 }
  0xc1   : > { %vm404_vm3 = vcmp.eq.s32.totalorder %v1582_v16, %v1614_v31  ;;  %v662_v12 = vadd.f32 %v630_v53, %v558_v52  ;;  %v439_v56 = vsel %vm403_vm2, %v1586_v19, 0.0  ;;  %vm507_vm4 = vcmp.eq.s32.totalorder %v1579_v13, %v1616_v32 }
  0xc2   : > { %v440_v57 = vsel %vm404_vm3, %v1586_v19, 0.0  ;;  %v471_v58 = vadd.f32 %v439_v56, %v367_v54  ;;  %vm508_vm5 = vcmp.eq.s32.totalorder %v1582_v16, %v1616_v32  ;;  %v543_v60 = vsel %vm507_vm4, %v1588_v20, 0.0 }
  0xc3   : > { %v472_v59 = vadd.f32 %v440_v57, %v368_v11  ;;  %v953_v61 = vpack.c.bf16 %v662_v12, %v661_v55  ;;  %v544_v62 = vsel %vm508_vm5, %v1588_v20, 0.0  ;;  %vm611_vm6 = vcmp.eq.s32.totalorder %v1579_v13, %v1618_v33 }
  0xc4   : > { %vm612_vm7 = vcmp.eq.s32.totalorder %v1582_v16, %v1618_v33  ;;  %v575_v63 = vadd.f32 %v543_v60, %v471_v58  ;;  %v647_v2 = vsel %vm611_vm6, %v1592_v23, 0.0  ;;  %vm315_vm8 = vcmp.eq.s32.totalorder %v1595_v24, %v1612_v30 }
  0xc5   : > { %v576_v0 = vadd.f32 %v544_v62, %v472_v59  ;;  %v648_v3 = vsel %vm612_vm7, %v1592_v23, 0.0  ;;  %954 = vmatpush3.bf16.msra.mxu0 %v953_v61  ;;  %vm316_vm9 = vcmp.eq.s32.totalorder %v1598_v25, %v1612_v30  ;;  %vm387_vm10 = vcmp.eq.s32.totalorder %v1595_v24, %v1614_v31 }
  0xc6   : > { %vm388_vm11 = vcmp.eq.s32.totalorder %v1598_v25, %v1614_v31  ;;  %v679_v13 = vadd.f32 %v647_v2, %v575_v63  ;;  %v351_v4 = vsel %vm315_vm8, %v1584_v18, 0.0  ;;  %v352_v5 = vsel %vm316_vm9, %v1584_v18, 0.0 }
  0xc7   : > { %v680_v16 = vadd.f32 %v648_v3, %v576_v0  ;;  %v423_v6 = vsel %vm387_vm10, %v1586_v19, 0.0  ;;  %v424_v7 = vsel %vm388_vm11, %v1586_v19, 0.0  ;;  %vm491_vm12 = vcmp.eq.s32.totalorder %v1595_v24, %v1616_v32 }
  0xc8   : > { %vm492_vm13 = vcmp.eq.s32.totalorder %v1598_v25, %v1616_v32  ;;  %v455_v14 = vadd.f32 %v423_v6, %v351_v4  ;;  %v456_v15 = vadd.f32 %v424_v7, %v352_v5  ;;  %v527_v17 = vsel %vm491_vm12, %v1588_v20, 0.0 }
  0xc9   : > { %v955_v8 = vpack.c.bf16 %v680_v16, %v679_v13  ;;  %v528_v21 = vsel %vm492_vm13, %v1588_v20, 0.0  ;;  %vm595_vm14 = vcmp.eq.s32.totalorder %v1595_v24, %v1618_v33  ;;  %vm596_vm15 = vcmp.eq.s32.totalorder %v1598_v25, %v1618_v33 }
  0xca   : > { %vm333_vm0 = vcmp.eq.s32.totalorder %v1601_v26, %v1612_v30  ;;  %v559_v22 = vadd.f32 %v527_v17, %v455_v14  ;;  %v560_v38 = vadd.f32 %v528_v21, %v456_v15  ;;  %v631_v39 = vsel %vm595_vm14, %v1592_v23, 0.0 }
  0xcb   : > { %956 = vmatprep.subr.bf16.mxu0 %v955_v8  ;;  %v632_v40 = vsel %vm596_vm15, %v1592_v23, 0.0  ;;  %vm334_vm1 = vcmp.eq.s32.totalorder %v1604_v27, %v1612_v30  ;;  %v369_v41 = vsel %vm333_vm0, %v1584_v18, 0.0  ;;  %vm405_vm2 = vcmp.eq.s32.totalorder %v1601_v26, %v1614_v31 }
  0xcc   : > { %vm406_vm3 = vcmp.eq.s32.totalorder %v1604_v27, %v1614_v31  ;;  %v663_v24 = vadd.f32 %v631_v39, %v559_v22  ;;  %v664_v25 = vadd.f32 %v632_v40, %v560_v38  ;;  %v370_v42 = vsel %vm334_vm1, %v1584_v18, 0.0 }
  0xcd   : > { %v441_v9 = vsel %vm405_vm2, %v1586_v19, 0.0  ;;  %v442_v10 = vsel %vm406_vm3, %v1586_v19, 0.0  ;;  %vm509_vm4 = vcmp.eq.s32.totalorder %v1601_v26, %v1616_v32  ;;  %vm510_vm5 = vcmp.eq.s32.totalorder %v1604_v27, %v1616_v32 }
  0xce   : > { %v473_v43 = vadd.f32 %v441_v9, %v369_v41  ;;  %v957_v44 = vpack.c.bf16 %v664_v25, %v663_v24  ;;  %v474_v45 = vadd.f32 %v442_v10, %v370_v42  ;;  %v545_v46 = vsel %vm509_vm4, %v1588_v20, 0.0 }
  0xcf   : > { %v546_v47 = vsel %vm510_vm5, %v1588_v20, 0.0  ;;  %vm613_vm6 = vcmp.eq.s32.totalorder %v1601_v26, %v1618_v33  ;;  %vm614_vm7 = vcmp.eq.s32.totalorder %v1604_v27, %v1618_v33  ;;  %vm317_vm8 = vcmp.eq.s32.totalorder %v1607_v28, %v1612_v30 }
  0xd0   : > { %v577_v48 = vadd.f32 %v545_v46, %v473_v43  ;;  %958 = vmatpush3.bf16.msra.mxu0 %v957_v44  ;;  %v578_v49 = vadd.f32 %v546_v47, %v474_v45  ;;  %v649_v50 = vsel %vm613_vm6, %v1592_v23, 0.0  ;;  %v650_v51 = vsel %vm614_vm7, %v1592_v23, 0.0 }
  0xd1   : > { %vm318_vm9 = vcmp.eq.s32.totalorder %v1610_v29, %v1612_v30  ;;  %v353_v53 = vsel %vm317_vm8, %v1584_v18, 0.0  ;;  %vm389_vm10 = vcmp.eq.s32.totalorder %v1607_v28, %v1614_v31  ;;  %vm390_vm11 = vcmp.eq.s32.totalorder %v1610_v29, %v1614_v31 }
  0xd2   : > { %v681_v52 = vadd.f32 %v649_v50, %v577_v48  ;;  %v354_v26 = vsel %vm318_vm9, %v1584_v18, 0.0  ;;  %v682_v27 = vadd.f32 %v650_v51, %v578_v49  ;;  %v425_v54 = vsel %vm389_vm10, %v1586_v19, 0.0 }
  0xd3   : > { %vm493_vm12 = vcmp.eq.s32.totalorder %v1607_v28, %v1616_v32  ;;  %v426_v55 = vsel %vm390_vm11, %v1586_v19, 0.0  ;;  %v457_v11 = vadd.f32 %v425_v54, %v353_v53  ;;  %vm494_vm13 = vcmp.eq.s32.totalorder %v1610_v29, %v1616_v32 }
  0xd4   : > { %v529_v12 = vsel %vm493_vm12, %v1588_v20, 0.0  ;;  %v959_v56 = vpack.c.bf16 %v682_v27, %v681_v52  ;;  %v458_v57 = vadd.f32 %v426_v55, %v354_v26  ;;  %v530_v58 = vsel %vm494_vm13, %v1588_v20, 0.0 }
  0xd5   : > { %vm597_vm14 = vcmp.eq.s32.totalorder %v1607_v28, %v1618_v33  ;;  %v561_v59 = vadd.f32 %v529_v12, %v457_v11  ;;  %vm598_vm15 = vcmp.eq.s32.totalorder %v1610_v29, %v1618_v33  ;;  %vm335_vm0 = vcmp.eq.s32.totalorder %v1621_v34, %v1612_v30 }
  0xd6   : > { %v633_v60 = vsel %vm597_vm14, %v1592_v23, 0.0  ;;  %960 = vmatprep.subr.bf16.mxu0 %v959_v56  ;;  %v562_v61 = vadd.f32 %v530_v58, %v458_v57  ;;  %v634_v62 = vsel %vm598_vm15, %v1592_v23, 0.0  ;;  %vm336_vm1 = vcmp.eq.s32.totalorder %v1624_v35, %v1612_v30 }
  0xd7   : > { %v371_v63 = vsel %vm335_vm0, %v1584_v18, 0.0  ;;  %v665_v0 = vadd.f32 %v633_v60, %v561_v59  ;;  %v372_v28 = vsel %vm336_vm1, %v1584_v18, 0.0  ;;  %vm407_vm2 = vcmp.eq.s32.totalorder %v1621_v34, %v1614_v31 }
  0xd8   : > { %vm408_vm3 = vcmp.eq.s32.totalorder %v1624_v35, %v1614_v31  ;;  %v666_v29 = vadd.f32 %v634_v62, %v562_v61  ;;  %v443_v2 = vsel %vm407_vm2, %v1586_v19, 0.0  ;;  %vm511_vm4 = vcmp.eq.s32.totalorder %v1621_v34, %v1616_v32 }
  0xd9   : > { %v444_v3 = vsel %vm408_vm3, %v1586_v19, 0.0  ;;  %v475_v13 = vadd.f32 %v443_v2, %v371_v63  ;;  %vm512_vm5 = vcmp.eq.s32.totalorder %v1624_v35, %v1616_v32  ;;  %v547_v4 = vsel %vm511_vm4, %v1588_v20, 0.0 }
  0xda   : > { %v476_v16 = vadd.f32 %v444_v3, %v372_v28  ;;  %v961_v5 = vpack.c.bf16 %v666_v29, %v665_v0  ;;  %v548_v6 = vsel %vm512_vm5, %v1588_v20, 0.0  ;;  %vm615_vm6 = vcmp.eq.s32.totalorder %v1621_v34, %v1618_v33 }
  0xdb   : > { %vm616_vm7 = vcmp.eq.s32.totalorder %v1624_v35, %v1618_v33  ;;  %v579_v7 = vadd.f32 %v547_v4, %v475_v13  ;;  %v651_v14 = vsel %vm615_vm6, %v1592_v23, 0.0  ;;  %vm319_vm8 = vcmp.eq.s32.totalorder %v1627_v36, %v1612_v30 }
  0xdc   : > { %v580_v8 = vadd.f32 %v548_v6, %v476_v16  ;;  %v652_v15 = vsel %vm616_vm7, %v1592_v23, 0.0  ;;  %962 = vmatpush3.bf16.msra.mxu0 %v961_v5  ;;  %vm320_vm9 = vcmp.eq.s32.totalorder %v1630_v37, %v1612_v30  ;;  %vm391_vm10 = vcmp.eq.s32.totalorder %v1627_v36, %v1614_v31 }
  0xdd   : > { %vm392_vm11 = vcmp.eq.s32.totalorder %v1630_v37, %v1614_v31  ;;  %v683_v34 = vadd.f32 %v651_v14, %v579_v7  ;;  %v355_v17 = vsel %vm319_vm8, %v1584_v18, 0.0  ;;  %v356_v21 = vsel %vm320_vm9, %v1584_v18, 0.0 }
  0xde   : > { %v684_v35 = vadd.f32 %v652_v15, %v580_v8  ;;  %v427_v22 = vsel %vm391_vm10, %v1586_v19, 0.0  ;;  %v428_v38 = vsel %vm392_vm11, %v1586_v19, 0.0  ;;  %vm495_vm12 = vcmp.eq.s32.totalorder %v1627_v36, %v1616_v32 }
  0xdf   : > { %vm496_vm13 = vcmp.eq.s32.totalorder %v1630_v37, %v1616_v32  ;;  %v459_v40 = vadd.f32 %v427_v22, %v355_v17  ;;  %v460_v41 = vadd.f32 %v428_v38, %v356_v21  ;;  %v531_v24 = vsel %vm495_vm12, %v1588_v20, 0.0 }
  0xe0   : > { %v963_v39 = vpack.c.bf16 %v684_v35, %v683_v34  ;;  %v532_v25 = vsel %vm496_vm13, %v1588_v20, 0.0  ;;  %vm599_vm14 = vcmp.eq.s32.totalorder %v1627_v36, %v1618_v33  ;;  %vm600_vm15 = vcmp.eq.s32.totalorder %v1630_v37, %v1618_v33 }
  0xe1   : > { %v301_v42 = vadd.s32 208, %v1555_v1  ;;  %v563_v9 = vadd.f32 %v531_v24, %v459_v40  ;;  %v564_v10 = vadd.f32 %v532_v25, %v460_v41  ;;  %v635_v43 = vsel %vm599_vm14, %v1592_v23, 0.0 }
  0xe2   : > { %964 = vmatprep.subr.bf16.mxu0 %v963_v39  ;;  %v636_v44 = vsel %vm600_vm15, %v1592_v23, 0.0  ;;  %v302_v45 = vadd.s32 216, %v1555_v1  ;;  %v285_v55 = vadd.s32 80, %v1555_v1  ;;  %v286_v11 = vadd.s32 88, %v1555_v1 }
  0xe3   : > { %vm337_vm0 = vcmp.eq.s32.totalorder %v301_v42, %v1612_v30  ;;  %vm409_vm1 = vcmp.eq.s32.totalorder %v301_v42, %v1614_v31  ;;  %vm513_vm2 = vcmp.eq.s32.totalorder %v301_v42, %v1616_v32  ;;  %v667_v36 = vadd.f32 %v635_v43, %v563_v9 }
  0xe4   : > { %v668_v46 = vadd.f32 %v636_v44, %v564_v10  ;;  %v373_v37 = vsel %vm337_vm0, %v1584_v18, 0.0  ;;  %v445_v47 = vsel %vm409_vm1, %v1586_v19, 0.0  ;;  %vm338_vm3 = vcmp.eq.s32.totalorder %v302_v45, %v1612_v30 }
  0xe5   : > { %vm410_vm4 = vcmp.eq.s32.totalorder %v302_v45, %v1614_v31  ;;  %v477_v48 = vadd.f32 %v445_v47, %v373_v37  ;;  %vm514_vm5 = vcmp.eq.s32.totalorder %v302_v45, %v1616_v32  ;;  %v374_v50 = vsel %vm338_vm3, %v1584_v18, 0.0 }
  0xe6   : > { %v965_v49 = vpack.c.bf16 %v668_v46, %v667_v36  ;;  %v446_v51 = vsel %vm410_vm4, %v1586_v19, 0.0  ;;  %v549_v52 = vsel %vm513_vm2, %v1588_v20, 0.0  ;;  %v550_v26 = vsel %vm514_vm5, %v1588_v20, 0.0 }
  0xe7   : > { %v478_v53 = vadd.f32 %v446_v51, %v374_v50  ;;  %v581_v27 = vadd.f32 %v549_v52, %v477_v48  ;;  %vm617_vm6 = vcmp.eq.s32.totalorder %v301_v42, %v1618_v33  ;;  %vm618_vm7 = vcmp.eq.s32.totalorder %v302_v45, %v1618_v33 }
  0xe8   : > { %966 = vmatpush3.bf16.msra.mxu0 %v965_v49  ;;  %v653_v54 = vsel %vm617_vm6, %v1592_v23, 0.0  ;;  %v654_v56 = vsel %vm618_vm7, %v1592_v23, 0.0  ;;  %v303_v58 = vadd.s32 224, %v1555_v1  ;;  %vm321_vm8 = vcmp.eq.s32.totalorder %v285_v55, %v1612_v30 }
  0xe9   : > { %v582_v12 = vadd.f32 %v550_v26, %v478_v53  ;;  %v685_v57 = vadd.f32 %v653_v54, %v581_v27  ;;  %vm322_vm9 = vcmp.eq.s32.totalorder %v286_v11, %v1612_v30  ;;  %vm393_vm10 = vcmp.eq.s32.totalorder %v285_v55, %v1614_v31 }
  0xea   : > { %vm394_vm11 = vcmp.eq.s32.totalorder %v286_v11, %v1614_v31  ;;  %v357_v60 = vsel %vm321_vm8, %v1584_v18, 0.0  ;;  %v358_v61 = vsel %vm322_vm9, %v1584_v18, 0.0  ;;  %v429_v62 = vsel %vm393_vm10, %v1586_v19, 0.0 }
  0xeb   : > { %v686_v59 = vadd.f32 %v654_v56, %v582_v12  ;;  %v430_v63 = vsel %vm394_vm11, %v1586_v19, 0.0  ;;  %v461_v0 = vadd.f32 %v429_v62, %v357_v60  ;;  %vm497_vm12 = vcmp.eq.s32.totalorder %v285_v55, %v1616_v32 }
  0xec   : > { %vm498_vm13 = vcmp.eq.s32.totalorder %v286_v11, %v1616_v32  ;;  %v462_v29 = vadd.f32 %v430_v63, %v358_v61  ;;  %v533_v2 = vsel %vm497_vm12, %v1588_v20, 0.0  ;;  %vm601_vm14 = vcmp.eq.s32.totalorder %v285_v55, %v1618_v33 }
  0xed   : > { %v967_v28 = vpack.c.bf16 %v686_v59, %v685_v57  ;;  %v534_v3 = vsel %vm498_vm13, %v1588_v20, 0.0  ;;  %v565_v13 = vadd.f32 %v533_v2, %v461_v0  ;;  %vm602_vm15 = vcmp.eq.s32.totalorder %v286_v11, %v1618_v33 }
  0xee   : > { %v304_v16 = vadd.s32 232, %v1555_v1  ;;  %v566_v4 = vadd.f32 %v534_v3, %v462_v29  ;;  %v637_v5 = vsel %vm601_vm14, %v1592_v23, 0.0  ;;  %v638_v6 = vsel %vm602_vm15, %v1592_v23, 0.0 }
  0xef   : > { %968 = vmatprep.subr.bf16.mxu0 %v967_v28  ;;  %vm339_vm0 = vcmp.eq.s32.totalorder %v303_v58, %v1612_v30  ;;  %v669_v7 = vadd.f32 %v637_v5, %v565_v13  ;;  %vm411_vm2 = vcmp.eq.s32.totalorder %v303_v58, %v1614_v31  ;;  %vm515_vm4 = vcmp.eq.s32.totalorder %v303_v58, %v1616_v32 }
  0xf0   : > { %vm340_vm1 = vcmp.eq.s32.totalorder %v304_v16, %v1612_v30  ;;  %v375_v8 = vsel %vm339_vm0, %v1584_v18, 0.0  ;;  %v670_v14 = vadd.f32 %v638_v6, %v566_v4  ;;  %vm412_vm3 = vcmp.eq.s32.totalorder %v304_v16, %v1614_v31 }
  0xf1   : > { %v376_v15 = vsel %vm340_vm1, %v1584_v18, 0.0  ;;  %v447_v34 = vsel %vm411_vm2, %v1586_v19, 0.0  ;;  %v448_v35 = vsel %vm412_vm3, %v1586_v19, 0.0  ;;  %vm516_vm5 = vcmp.eq.s32.totalorder %v304_v16, %v1616_v32 }
  0xf2   : > { %v479_v17 = vadd.f32 %v447_v34, %v375_v8  ;;  %v969_v21 = vpack.c.bf16 %v670_v14, %v669_v7  ;;  %v480_v22 = vadd.f32 %v448_v35, %v376_v15  ;;  %v551_v38 = vsel %vm515_vm4, %v1588_v20, 0.0 }
  0xf3   : > { %v552_v39 = vsel %vm516_vm5, %v1588_v20, 0.0  ;;  %vm619_vm6 = vcmp.eq.s32.totalorder %v303_v58, %v1618_v33  ;;  %vm620_vm7 = vcmp.eq.s32.totalorder %v304_v16, %v1618_v33  ;;  %v287_v41 = vadd.s32 96, %v1555_v1 }
  0xf4   : > { %v583_v40 = vadd.f32 %v551_v38, %v479_v17  ;;  %970 = vmatpush3.bf16.msra.mxu0 %v969_v21  ;;  %v584_v24 = vadd.f32 %v552_v39, %v480_v22  ;;  %v655_v25 = vsel %vm619_vm6, %v1592_v23, 0.0  ;;  %v656_v42 = vsel %vm620_vm7, %v1592_v23, 0.0  ;;  %v691_v22 = vld [vmem:[%s233_s23] sm:$0xff] }
  0xf5   : > { %v288_v9 = vadd.s32 104, %v1555_v1  ;;  %vm323_vm8 = vcmp.eq.s32.totalorder %v287_v41, %v1612_v30  ;;  %vm395_vm9 = vcmp.eq.s32.totalorder %v287_v41, %v1614_v31  ;;  %vm499_vm10 = vcmp.eq.s32.totalorder %v287_v41, %v1616_v32 }
  0xf6   : > { %v687_v10 = vadd.f32 %v655_v25, %v583_v40  ;;  %v688_v43 = vadd.f32 %v656_v42, %v584_v24  ;;  %v359_v44 = vsel %vm323_vm8, %v1584_v18, 0.0  ;;  %v431_v36 = vsel %vm395_vm9, %v1586_v19, 0.0 }
  0xf7   : > { %vm324_vm11 = vcmp.eq.s32.totalorder %v288_v9, %v1612_v30  ;;  %vm396_vm12 = vcmp.eq.s32.totalorder %v288_v9, %v1614_v31  ;;  %vm500_vm13 = vcmp.eq.s32.totalorder %v288_v9, %v1616_v32  ;;  %v463_v47 = vadd.f32 %v431_v36, %v359_v44 }
  0xf8   : > { %v360_v45 = vsel %vm324_vm11, %v1584_v18, 0.0  ;;  %v432_v46 = vsel %vm396_vm12, %v1586_v19, 0.0  ;;  %v971_v37 = vpack.c.bf16 %v688_v43, %v687_v10  ;;  %v535_v49 = vsel %vm499_vm10, %v1588_v20, 0.0 }
  0xf9   : > { %v464_v48 = vadd.f32 %v432_v46, %v360_v45  ;;  %v536_v50 = vsel %vm500_vm13, %v1588_v20, 0.0  ;;  %vm603_vm14 = vcmp.eq.s32.totalorder %v287_v41, %v1618_v33  ;;  %vm604_vm15 = vcmp.eq.s32.totalorder %v288_v9, %v1618_v33 }
  0xfa   : > { %v305_v51 = vadd.s32 240, %v1555_v1  ;;  %972 = vmatprep.subr.bf16.mxu0 %v971_v37  ;;  %v567_v52 = vadd.f32 %v535_v49, %v463_v47  ;;  %v639_v26 = vsel %vm603_vm14, %v1592_v23, 0.0  ;;  %v640_v27 = vsel %vm604_vm15, %v1592_v23, 0.0 }
  0xfb   : > { %v568_v53 = vadd.f32 %v536_v50, %v464_v48  ;;  %v306_v54 = vadd.s32 248, %v1555_v1  ;;  %v289_v29 = vadd.s32 112, %v1555_v1  ;;  %v290_v2 = vadd.s32 120, %v1555_v1 }
  0xfc   : > { %vm341_vm0 = vcmp.eq.s32.totalorder %v305_v51, %v1612_v30  ;;  %vm413_vm1 = vcmp.eq.s32.totalorder %v305_v51, %v1614_v31  ;;  %vm517_vm2 = vcmp.eq.s32.totalorder %v305_v51, %v1616_v32  ;;  %v671_v55 = vadd.f32 %v639_v26, %v567_v52 }
  0xfd   : > { %v672_v11 = vadd.f32 %v640_v27, %v568_v53  ;;  %v377_v12 = vsel %vm341_vm0, %v1584_v18, 0.0  ;;  %v449_v56 = vsel %vm413_vm1, %v1586_v19, 0.0  ;;  %vm342_vm3 = vcmp.eq.s32.totalorder %v306_v54, %v1612_v30 }
  0xfe   : > { %vm414_vm4 = vcmp.eq.s32.totalorder %v306_v54, %v1614_v31  ;;  %v481_v57 = vadd.f32 %v449_v56, %v377_v12  ;;  %vm518_vm5 = vcmp.eq.s32.totalorder %v306_v54, %v1616_v32  ;;  %v378_v59 = vsel %vm342_vm3, %v1584_v18, 0.0 }
  0xff   : > { %v973_v58 = vpack.c.bf16 %v672_v11, %v671_v55  ;;  %v450_v60 = vsel %vm414_vm4, %v1586_v19, 0.0  ;;  %v553_v61 = vsel %vm517_vm2, %v1588_v20, 0.0  ;;  %v554_v63 = vsel %vm518_vm5, %v1588_v20, 0.0 }
 0x100   : > { %v482_v62 = vadd.f32 %v450_v60, %v378_v59  ;;  %v585_v0 = vadd.f32 %v553_v61, %v481_v57  ;;  %vm621_vm6 = vcmp.eq.s32.totalorder %v305_v51, %v1618_v33  ;;  %vm622_vm7 = vcmp.eq.s32.totalorder %v306_v54, %v1618_v33 }
 0x101   : > { %974 = vmatpush3.bf16.msra.mxu0 %v973_v58  ;;  %v657_v28 = vsel %vm621_vm6, %v1592_v23, 0.0  ;;  %v658_v13 = vsel %vm622_vm7, %v1592_v23, 0.0  ;;  %vm325_vm8 = vcmp.eq.s32.totalorder %v289_v29, %v1612_v30  ;;  %vm326_vm9 = vcmp.eq.s32.totalorder %v290_v2, %v1612_v30 }
 0x102   : > { %v586_v3 = vadd.f32 %v554_v63, %v482_v62  ;;  %v689_v16 = vadd.f32 %v657_v28, %v585_v0  ;;  %vm397_vm10 = vcmp.eq.s32.totalorder %v289_v29, %v1614_v31  ;;  %vm398_vm11 = vcmp.eq.s32.totalorder %v290_v2, %v1614_v31 }
 0x103   : > { %v361_v5 = vsel %vm325_vm8, %v1584_v18, 0.0  ;;  %v362_v6 = vsel %vm326_vm9, %v1584_v18, 0.0  ;;  %v433_v7 = vsel %vm397_vm10, %v1586_v19, 0.0  ;;  %v434_v1 = vsel %vm398_vm11, %v1586_v19, 0.0 }
 0x104   : > { %v690_v4 = vadd.f32 %v658_v13, %v586_v3  ;;  %v465_v8 = vadd.f32 %v433_v7, %v361_v5  ;;  %vm501_vm12 = vcmp.eq.s32.totalorder %v289_v29, %v1616_v32  ;;  %vm502_vm13 = vcmp.eq.s32.totalorder %v290_v2, %v1616_v32 }
 0x105   : > { %v466_v14 = vadd.f32 %v434_v1, %v362_v6  ;;  %v537_v31 = vsel %vm501_vm12, %v1588_v20, 0.0  ;;  %v538_v15 = vsel %vm502_vm13, %v1588_v20, 0.0  ;;  %vm605_vm14 = vcmp.eq.s32.totalorder %v289_v29, %v1618_v33 }
 0x106   : > { %v975_v30 = vpack.c.bf16 %v690_v4, %v689_v16  ;;  %v569_v34 = vadd.f32 %v537_v31, %v465_v8  ;;  %vm606_vm15 = vcmp.eq.s32.totalorder %v290_v2, %v1618_v33  ;;  %v641_v19 = vsel %vm605_vm14, %v1592_v23, 0.0 }
 0x107   : > { %v570_v18 = vadd.f32 %v538_v15, %v466_v14  ;;  %v642_v32 = vsel %vm606_vm15, %v1592_v23, 0.0 }
 0x108   : > { %976 = vmatprep.subr.bf16.mxu0 %v975_v30  ;;  %v673_v35 = vadd.f32 %v641_v19, %v569_v34 }
 0x109   : > { %v674_v17 = vadd.f32 %v642_v32, %v570_v18 }
 0x10b   : > { %v977_v21 = vpack.c.bf16 %v674_v17, %v673_v35 }
 0x10d   : > { %978 = vmatpush3.bf16.msra.mxu0 %v977_v21 }
 0x110   : > { %758 = vmatmul.mubr.f32.vlgmr.msra.gmra.mrb[0].mxu0 %v691_v22 }
 0x1e3   : > { %v944_v20 = vpop.f32.mrb[0].mxu0 }
 0x1e4   : > { %v945_v33 = vpop.f32.mrb[1].mxu0 }
 0x1e5   : > { %v946_v38 = vadd.f32 %v945_v33, %v944_v20 }
 0x1e7   : > { %763 = vst [vmem:[%s265_s24] sm:$0xff] %v946_v38 }
 0x1e8   : > { %1177 = shalt.err (!%p1174_p1)
}
 0x1e9   : > { %s1178_s10 = scalar_lea.hbm %s1979_s22, 128  ;;  %s1182_s15 = scalar_lea.hbm %s2036_s4, 256 }
 0x1ea   : > { %p1179_p10 = scmp.ne.s32.totalorder %s1979_s22, %s1178_s10  ;;  %p1183_p12 = scmp.lt.u32.totalorder %s1979_s22, %s2036_s4 }
 0x1eb   : > { %p1184_p9 = scmp.lt.u32.totalorder %s1182_s15, %s1178_s10  ;;  %p1186_p11 = scmp.lt.u32.totalorder %s1178_s10, %s1979_s22 }
 0x1ec   : > { %p1180_p8 = pnand %p1179_p10, %p2065_p3 }
 0x1ed   : > { %p1185_p6 = por %p1184_p9, %p1183_p12 }
 0x1ee   : > { %p1181_p4 = pneg %p1180_p8 }
 0x1ef   : > { %p1187_p0 = por %p1186_p11, %p1185_p6 }
 0x1f1   : > { %p1188_p5 = pnand %p1187_p0, %p1181_p4 }
 0x1f3   : > { %1191 = shalt.err (!%p1188_p5)
}
 0x1f4   : > { %987 = dma.vmem_to_hbm [thread:$0]  (%p2065_p3), %s1981_s1, 128, %s1979_s22, %s765_s21  }
 0x1f5 PF: > { %s790_s11 = sand.u32 1, %s1252_s28   ;;  %p2066_p7 = scmp.ne.s32.totalorder %s2048_s14, 0 }
 0x1f6   : > { %p2067_p2 = scmp.ge.s32.totalorder %s1264_s30, 2  ;;  %s791_s18 = scalar_lea.sflag [#allocation6], %s790_s11 }
 0x1f8   : > { %p1002_p13 = pnand %p2067_p2, %p2066_p7 }
 0x1fa   : > { %1235 = dma.done.wait (!%p1002_p13), %s791_s18, 128  }
 0x1fb   : > { %1237 = vsyncadd (!%p1002_p13), %s791_s18, 4294967168  ;;  %s2068_s13 = sld [smem:[#allocation18_spill]]  ;;  %p24_p3 = scmp.ge.s32.totalorder %s1348_s7, 4  }
 0x1fc   : > { %s2069_s25 = smov %s1244_s26  ;;  %s2070_s26 = smov %s1248_s27 }
 0x1fd   : > { %s2071_s27 = smov %s1497_s19  ;;  %s2072_s28 = smov %s1256_s29 }
 0x1fe   : > { %s2073_s29 = smov %s1260_s0  ;;  %s2075_s30 = smov %s1348_s7 }
 0x1ff   :  { %26 = sbr.rel (!%p24_p3) target bundleno = 22 (0x16), region = 101 }
 0x201   : > { %s2074_s0 = smov %s2068_s13 }
 0x206   :  { %796 = vsyncpa [#allocation5], 1 }
 0x207   :  { %798 = vsyncpa [#allocation5 + $0x1], 1 }
 0x208   :  { %799 = vsyncpa [#allocation8], 1 }
 0x209   :  { %801 = vsyncpa [#allocation8 + $0x1], 1 }
 0x20a   :  { %802 = vsyncpa [#allocation6], 1 }
 0x20b   :  { %804 = vsyncpa [#allocation6 + $0x1], 1 }

</bundles_post_ra>
